<compile_context>
chip_gen: v7x
topology: tpu7x:2x2x1
jax: 0.10.0
libtpu: 0.0.40
codegen_flags: <defaults>
</compile_context>

<pallas_src>
from functools import lru_cache

import numpy as np
import jax
import jax.numpy as jnp
from jax.experimental import pallas as pl
from jax.experimental.pallas import tpu as pltpu

K1 = np.array([1.0, 4.0, 6.0, 4.0, 1.0], dtype=np.float64)  # binomial 5-tap

MAX_PLANES_PER_STEP = 64       # bound on packed plane-groups per grid step
TINY_LEVEL_BYTES = 2 << 20     # below this, a level is launch/overhead bound


# ----------------------------------------------------------------------------
# Operator-matrix construction (deterministic trace-time glue)
# ----------------------------------------------------------------------------
def _reflect(t, n):
    # PyTorch 'reflect' padding index map (no edge repeat).
    if t < 0:
        return -t
    if t >= n:
        return 2 * n - 2 - t
    return t


@lru_cache(maxsize=None)
def _reduce_matrix_np(n):
    """(No, n): reflect-pad(2) + 5-tap blur (K1/16 per axis) + stride 2."""
    no = (n - 1) // 2 + 1
    a = np.zeros((no, n), dtype=np.float64)
    for i in range(no):
        for d in range(5):
            a[i, _reflect(2 * i + d - 2, n)] += K1[d] / 16.0
    return a


@lru_cache(maxsize=None)
def _expand_matrix_np(n):
    """(2n, n): zero-unpool (x2) + reflect-pad(2) + 5-tap blur (K1/8 per axis)."""
    u = 2 * n
    c = np.zeros((u, n), dtype=np.float64)
    for y in range(u):
        for d in range(5):
            t = _reflect(y + d - 2, u)
            if t % 2 == 0:
                c[y, t // 2] += K1[d] / 8.0
    return c


def _level_operators(h, w, k, with_expand):
    """Build the per-level operator matrices (lane ops kron-packed by k)."""
    a_np = _reduce_matrix_np(h)                  # (Ho, H)
    bt_np = _reduce_matrix_np(w).T               # (W, Wo)
    if k > 1:
        bt_np = np.kron(np.eye(k), bt_np)        # block-diag: planes stay independent
    a_t = jnp.asarray(a_np.T, jnp.float32)       # (H, Ho)   sublane reduce
    btp = jnp.asarray(bt_np, jnp.float32)        # (Wp, Wop) lane reduce
    if not with_expand:
        return a_t, btp
    ho = a_np.shape[0]
    wo = (w - 1) // 2 + 1
    c_np = _expand_matrix_np(ho)                 # (H, Ho)
    dt_np = _expand_matrix_np(wo).T              # (Wo, W)
    if k > 1:
        dt_np = np.kron(np.eye(k), dt_np)
    c_t = jnp.asarray(c_np.T, jnp.float32)       # (Ho, H)   sublane expand
    dtp = jnp.asarray(dt_np, jnp.float32)        # (Wop, Wp) lane expand
    return a_t, btp, c_t, dtp


# ----------------------------------------------------------------------------
# Lane packing of planes (wrapper-side; kernel is layout-agnostic)
# ----------------------------------------------------------------------------
def _lane_pack_factor(w):
    """Pack k planes along lanes so output last dims are >= 128 (lane-dense)."""
    return 1 if w >= 128 else -(-128 // w)


def _pack_planes(x, k):
    """(B, H, W) -> (ceil(B/k), H, k*W): planes side by side on the lane axis."""
    if k == 1:
        return x
    b, h, w = x.shape
    bp = -(-b // k) * k
    if bp != b:
        x = jnp.concatenate([x, jnp.zeros((bp - b, h, w), x.dtype)], axis=0)
    return x.reshape(bp // k, k, h, w).transpose(0, 2, 1, 3).reshape(bp // k, h, k * w)


def _unpack_planes(xp, k, b):
    """Inverse of _pack_planes, slicing back to the first b planes."""
    if k == 1:
        return xp[:b]
    g, h, kw = xp.shape
    w = kw // k
    return xp.reshape(g, h, k, w).transpose(0, 2, 1, 3).reshape(g * k, h, w)[:b]


# ----------------------------------------------------------------------------
# Per-generation VMEM policy and block sizing
# ----------------------------------------------------------------------------
def _vmem_policy():
    """(block_budget_bytes, vmem_limit_bytes) per TPU generation."""
    try:
        cap = int(pltpu.get_tpu_info().vmem_capacity_bytes)
    except Exception:
        cap = 64 << 20                       # conservative (v7x-sized) fallback
    if cap >= (96 << 20):                    # v5e / v6e: 128 MiB physical VMEM
        return 64 << 20, 100 << 20
    return 24 << 20, 48 << 20                # v7x: 64 MiB per TensorCore


def _reduce_vmem_bytes(bb, h, wp, ho, wop):
    ops = h * ho + wp * wop                              # operator blocks
    blocks = bb * (h * wp + ho * wop)                    # pipelined in/out blocks
    live = bb * (h * wp + 2 * h * wop + 2 * ho * wop)    # matmul/transpose temps
    return 4 * (2 * (ops + blocks) + live)               # x2: double buffering


def _fused_vmem_bytes(bb, h, wp, ho, wop):
    ops = 2 * h * ho + 2 * wp * wop
    blocks = bb * (2 * h * wp + ho * wop)                # prev in, det out, r out
    live = bb * (2 * h * wp + 4 * h * wop + 2 * ho * wop)
    return 4 * (2 * (ops + blocks) + live)


def _pick_bblk(groups, bytes_fn, budget):
    cap = 1
    for bb in range(1, min(groups, MAX_PLANES_PER_STEP) + 1):
        if bytes_fn(bb) <= budget:
            cap = bb
        else:
            break
    # tiny deep level: per-step/launch overhead dominates -> single grid step
    if groups <= cap and bytes_fn(groups) <= TINY_LEVEL_BYTES:
        return groups
    # otherwise aim for >= 4 grid steps (2 per v7x TensorCore so both cores keep
    # a double-buffered pipeline); VMEM cap always wins.
    return max(1, min(cap, -(-groups // 4)))


def _grid_for(groups, bblk):
    """Prefer a divisor of `groups` near bblk (no padding); otherwise pad."""
    for b in range(bblk, max(1, bblk // 2) - 1, -1):
        if groups % b == 0:
            return b, groups
    return bblk, -(-groups // bblk) * bblk


def _pad_groups(xp, gp):
    g, h, wp = xp.shape
    if gp == g:
        return xp
    return jnp.concatenate([xp, jnp.zeros((gp - g, h, wp), xp.dtype)], axis=0)


# ----------------------------------------------------------------------------
# Pallas kernels
# ----------------------------------------------------------------------------
def _swap_minor(x):
    """(g, a, b) -> (g, b, a): XLU transpose of the minor two dims."""
    g, a, b = x.shape
    if g == 1:                       # plain 2-D transpose for single-group blocks
        return x.reshape(a, b).T.reshape(1, b, a)
    return jnp.swapaxes(x, 1, 2)


def _reduce_kernel(a_t_ref, bt_ref, x_ref, r_ref):
    # a_t_ref: (H, Ho)  bt_ref: (Wp, Wop)  x_ref: (Bb, H, Wp) -> r_ref: (Bb, Ho, Wop)
    bb, h, wp = x_ref.shape
    ho = a_t_ref.shape[1]
    wop = bt_ref.shape[1]
    # lane contraction (blur+stride along W): one flattened MXU matmul
    t = jnp.dot(x_ref[...].reshape(bb * h, wp), bt_ref[...],
                preferred_element_type=jnp.float32).reshape(bb, h, wop)
    # sublane contraction (blur+stride along H): one transpose + one matmul
    t_t = _swap_minor(t)                                        # (Bb, Wop, H)
    r_t = jnp.dot(t_t.reshape(bb * wop, h), a_t_ref[...],
                  preferred_element_type=jnp.float32).reshape(bb, wop, ho)
    r_ref[...] = _swap_minor(r_t).astype(r_ref.dtype)


def _fused_level_kernel(a_t_ref, bt_ref, c_t_ref, dt_ref, prev_ref, r_ref, det_ref):
    # Fused reduce + expand + ReLU detail for one block of (packed) planes.
    #   a_t_ref: (H, Ho)  bt_ref: (Wp, Wop)  c_t_ref: (Ho, H)  dt_ref: (Wop, Wp)
    #   prev_ref: (Bb, H, Wp) -> r_ref: (Bb, Ho, Wop), det_ref: (Bb, H, Wp)
    bb, h, wp = prev_ref.shape
    ho = a_t_ref.shape[1]
    wop = bt_ref.shape[1]

    # ---- reduce:  r = A . prev . Bt  (two flattened MXU matmuls) ----
    t = jnp.dot(prev_ref[...].reshape(bb * h, wp), bt_ref[...],
                preferred_element_type=jnp.float32).reshape(bb, h, wop)
    t_t = _swap_minor(t)                                        # (Bb, Wop, H)
    r_t2 = jnp.dot(t_t.reshape(bb * wop, h), a_t_ref[...],
                   preferred_element_type=jnp.float32)          # (Bb*Wop, Ho)
    # small reduced block stored first (cheap; ordering not load-bearing)
    r_ref[...] = _swap_minor(r_t2.reshape(bb, wop, ho)).astype(r_ref.dtype)

    # ---- expand + detail:  det = relu(prev - C . r . Dt) ----
    u_t2 = jnp.dot(r_t2, c_t_ref[...],
                   preferred_element_type=jnp.float32)          # (Bb*Wop, H)
    u = _swap_minor(u_t2.reshape(bb, wop, h))                   # (Bb, H, Wop)
    e = jnp.dot(u.reshape(bb * h, wop), dt_ref[...],
                preferred_element_type=jnp.float32).reshape(bb, h, wp)
    # re-read prev from the (already resident) input block so its first copy
    # is dead by now -> smaller live set on v7x's 64 MiB VMEM.
    det_ref[...] = jnp.maximum(prev_ref[...] - e, 0.0).astype(det_ref.dtype)


# ----------------------------------------------------------------------------
# pallas_call wrappers (one level each)
# ----------------------------------------------------------------------------
def reduce_op(img):
    """Level-0 reduce only: (B, H, W) -> (B, Ho, Wo)."""
    b, h, w = img.shape
    ho, wo = (h - 1) // 2 + 1, (w - 1) // 2 + 1
    k = _lane_pack_factor(w)
    a_t, btp = _level_operators(h, w, k, with_expand=False)
    xp = _pack_planes(img, k)
    g, _, wp = xp.shape
    wop = k * wo

    budget, vmem_limit = _vmem_policy()
    bblk = _pick_bblk(g, lambda bb: _reduce_vmem_bytes(bb, h, wp, ho, wop), budget)
    bblk, gp = _grid_for(g, bblk)
    xp = _pad_groups(xp, gp)

    rp = pl.pallas_call(
        _reduce_kernel,
        out_shape=jax.ShapeDtypeStruct((gp, ho, wop), img.dtype),
        grid=(gp // bblk,),
        in_specs=[
            pl.BlockSpec((h, ho), lambda i: (0, 0)),
            pl.BlockSpec((wp, wop), lambda i: (0, 0)),
            pl.BlockSpec((bblk, h, wp), lambda i: (i, 0, 0)),
        ],
        out_specs=pl.BlockSpec((bblk, ho, wop), lambda i: (i, 0, 0)),
        compiler_params=pltpu.CompilerParams(
            dimension_semantics=("parallel",),
            vmem_limit_bytes=vmem_limit),
    )(a_t, btp, xp)
    return _unpack_planes(rp, k, b)


def fused_level_op(img):
    """One pyramid level: (B, H, W) -> (reduced (B, H/2, W/2), detail (B, H, W))."""
    b, h, w = img.shape
    ho, wo = h // 2, w // 2
    k = _lane_pack_factor(w)
    a_t, btp, c_t, dtp = _level_operators(h, w, k, with_expand=True)
    xp = _pack_planes(img, k)
    g, _, wp = xp.shape
    wop = k * wo

    budget, vmem_limit = _vmem_policy()
    bblk = _pick_bblk(g, lambda bb: _fused_vmem_bytes(bb, h, wp, ho, wop), budget)
    bblk, gp = _grid_for(g, bblk)
    xp = _pad_groups(xp, gp)

    rp, detp = pl.pallas_call(
        _fused_level_kernel,
        out_shape=(jax.ShapeDtypeStruct((gp, ho, wop), img.dtype),
                   jax.ShapeDtypeStruct((gp, h, wp), img.dtype)),
        grid=(gp // bblk,),
        in_specs=[
            pl.BlockSpec((h, ho), lambda i: (0, 0)),
            pl.BlockSpec((wp, wop), lambda i: (0, 0)),
            pl.BlockSpec((ho, h), lambda i: (0, 0)),
            pl.BlockSpec((wop, wp), lambda i: (0, 0)),
            pl.BlockSpec((bblk, h, wp), lambda i: (i, 0, 0)),
        ],
        out_specs=(pl.BlockSpec((bblk, ho, wop), lambda i: (i, 0, 0)),
                   pl.BlockSpec((bblk, h, wp), lambda i: (i, 0, 0))),
        compiler_params=pltpu.CompilerParams(
            dimension_semantics=("parallel",),
            vmem_limit_bytes=vmem_limit),
    )(a_t, btp, c_t, dtp, xp)
    return _unpack_planes(rp, k, b), _unpack_planes(detp, k, b)


# ----------------------------------------------------------------------------
# Module wrapper: LaplacianPyramid.forward
# ----------------------------------------------------------------------------
def laplacian_pyramid(x, n_levels):
    """x: (N, C=3, H, W) float32 -> list of n_levels arrays (NCHW)."""
    assert n_levels >= 1
    N, C, H, W = x.shape
    B = N * C
    img = x.reshape(B, H, W).astype(jnp.float32)
    pyramid = []

    # level 0: reduce only (no detail yet).
    assert H >= 3 and W >= 3, "reflect pad=2 requires spatial dims >= 3"
    img = reduce_op(img)

    # levels 1 .. n_levels-1: fused reduce + expand + ReLU detail (one call each).
    for _ in range(1, n_levels):
        h_in, w_in = img.shape[1], img.shape[2]
        assert h_in >= 3 and w_in >= 3, "reflect pad=2 requires spatial dims >= 3"
        assert h_in % 2 == 0 and w_in % 2 == 0, \
            "expand/subtract needs even dims (same constraint as the torch module)"
        img, det = fused_level_op(img)
        pyramid.append(det.reshape(N, C, det.shape[1], det.shape[2]))

    pyramid.append(img.reshape(N, C, img.shape[1], img.shape[2]))
    return pyramid


# ----------------------------------------------------------------------------
# Pure-JAX reference (direct stencil) used only for a numerical sanity check.
# ----------------------------------------------------------------------------
def _ref_reduce(img):
    k2 = np.outer(K1, K1) / 256.0
    H, W = img.shape[1], img.shape[2]
    Ho, Wo = (H - 1) // 2 + 1, (W - 1) // 2 + 1
    p = jnp.pad(img, ((0, 0), (2, 2), (2, 2)), mode="reflect")
    out = jnp.zeros((img.shape[0], Ho, Wo), dtype=jnp.float32)
    for dy in range(5):
        for dx in range(5):
            out = out + k2[dy, dx] * p[:, dy:dy + 2 * (Ho - 1) + 1:2,
                                          dx:dx + 2 * (Wo - 1) + 1:2]
    return out


def _ref_expand(r):
    B, h, w = r.shape
    u = jnp.zeros((B, 2 * h, 2 * w), dtype=jnp.float32).at[:, ::2, ::2].set(r)
    k2 = 4.0 * np.outer(K1, K1) / 256.0
    p = jnp.pad(u, ((0, 0), (2, 2), (2, 2)), mode="reflect")
    out = jnp.zeros_like(u)
    for dy in range(5):
        for dx in range(5):
            out = out + k2[dy, dx] * p[:, dy:dy + 2 * h, dx:dx + 2 * w]
    return out


def _ref_pyramid(x, n_levels):
    N, C, H, W = x.shape
    img = x.reshape(N * C, H, W).astype(jnp.float32)
    prev, pyr = None, []
    for _ in range(n_levels):
        img = _ref_reduce(img)
        if prev is not None:
            e = _ref_expand(img)
            pyr.append(jnp.maximum(prev - e, 0.0).reshape(N, C, *prev.shape[1:]))
        prev = img
    pyr.append(img.reshape(N, C, *img.shape[1:]))
    return pyr


if __name__ == "__main__":
    key = jax.random.PRNGKey(0)
    N, C, H, W = 2, 3, 16, 16          # module is fixed at 3 channels
    n_levels = 3
    x = jax.random.uniform(key, (N, C, H, W), dtype=jnp.float32)

    pyr = laplacian_pyramid(x, n_levels)
    pyr = [jax.block_until_ready(p) for p in pyr]

    # correctness check vs. direct stencil reference
    ref = _ref_pyramid(x, n_levels)
    assert len(pyr) == len(ref) == n_levels
    for got, want in zip(pyr, ref):
        assert got.shape == want.shape, (got.shape, want.shape)
        np.testing.assert_allclose(np.asarray(got), np.asarray(want),
                                   rtol=1e-4, atol=1e-5)

    print("KERNEL_OK")
</pallas_src>

<mosaic_0001>
module attributes {stable_mosaic.version = 11 : i64} {
  func.func @_reduce_kernel(%arg0: i32, %arg1: memref<16x8xf32, #tpu.memory_space<vmem>>, %arg2: memref<128x64xf32, #tpu.memory_space<vmem>>, %arg3: memref<1x16x128xf32, #tpu.memory_space<vmem>>, %arg4: memref<1x8x64xf32, #tpu.memory_space<vmem>>) attributes {dimension_semantics = [#tpu.dimension_semantics<parallel>], iteration_bounds = array<i64: 1>, scalar_prefetch = 0 : i64, scratch_operands = 0 : i64, tpu.core_type = #tpu.core_type<tc>, window_params = [{pipeline_mode = #tpu.pipeline_mode<synchronous>, transform_indices = @transform_0, window_bounds = array<i64: 16, 8>}, {pipeline_mode = #tpu.pipeline_mode<synchronous>, transform_indices = @transform_1, window_bounds = array<i64: 128, 64>}, {transform_indices = @transform_2, window_bounds = array<i64: 1, 16, 128>}, {transform_indices = @transform_3, window_bounds = array<i64: 1, 8, 64>}]} {
    %c0 = arith.constant 0 : index
    %c0_0 = arith.constant 0 : index
    %c0_1 = arith.constant 0 : index
    %0 = vector.load %arg3[%c0, %c0_0, %c0_1] : memref<1x16x128xf32, #tpu.memory_space<vmem>>, vector<1x16x128xf32>
    %1 = vector.shape_cast %0 : vector<1x16x128xf32> to vector<16x128xf32>
    %c0_2 = arith.constant 0 : index
    %c0_3 = arith.constant 0 : index
    %2 = vector.load %arg2[%c0_2, %c0_3] : memref<128x64xf32, #tpu.memory_space<vmem>>, vector<128x64xf32>
    %cst = arith.constant dense<0.000000e+00> : vector<16x64xf32>
    %3 = tpu.matmul %1, %2, %cst {dimension_numbers = #tpu.dot_dimension_numbers<[1], [0], [0], [1], [0, 0, 1, 1], [], []>} : vector<16x128xf32>, vector<128x64xf32>, vector<16x64xf32> -> vector<16x64xf32>
    %4 = vector.shape_cast %3 : vector<16x64xf32> to vector<1x16x64xf32>
    %5 = vector.shape_cast %4 : vector<1x16x64xf32> to vector<16x64xf32>
    %6 = tpu.transpose %5, [1, 0] : vector<16x64xf32> -> vector<64x16xf32>
    %7 = vector.shape_cast %6 : vector<64x16xf32> to vector<1x64x16xf32>
    %8 = vector.shape_cast %7 : vector<1x64x16xf32> to vector<64x16xf32>
    %c0_4 = arith.constant 0 : index
    %c0_5 = arith.constant 0 : index
    %9 = vector.load %arg1[%c0_4, %c0_5] : memref<16x8xf32, #tpu.memory_space<vmem>>, vector<16x8xf32>
    %cst_6 = arith.constant dense<0.000000e+00> : vector<64x8xf32>
    %10 = tpu.matmul %8, %9, %cst_6 {dimension_numbers = #tpu.dot_dimension_numbers<[1], [0], [0], [1], [0, 0, 1, 1], [], []>} : vector<64x16xf32>, vector<16x8xf32>, vector<64x8xf32> -> vector<64x8xf32>
    %11 = vector.shape_cast %10 : vector<64x8xf32> to vector<1x64x8xf32>
    %12 = vector.shape_cast %11 : vector<1x64x8xf32> to vector<64x8xf32>
    %13 = tpu.transpose %12, [1, 0] : vector<64x8xf32> -> vector<8x64xf32>
    %14 = vector.shape_cast %13 : vector<8x64xf32> to vector<1x8x64xf32>
    %c0_7 = arith.constant 0 : index
    %c0_8 = arith.constant 0 : index
    %c0_9 = arith.constant 0 : index
    %15 = vector.load %arg4[%c0_7, %c0_8, %c0_9] : memref<1x8x64xf32, #tpu.memory_space<vmem>>, vector<1x8x64xf32>
    tpu.vector_store %arg4[%c0_7, %c0_8, %c0_9], %14 {strides = array<i32>} : memref<1x8x64xf32, #tpu.memory_space<vmem>>, vector<1x8x64xf32>,
    return
  }
  func.func @transform_0(%arg0: i32) -> (i32, i32) {
    %c0_i32 = arith.constant 0 : i32
    %c0_i32_0 = arith.constant 0 : i32
    %c0_i32_1 = arith.constant 0 : i32
    return %c0_i32, %c0_i32_0 : i32, i32
  }
  func.func @transform_1(%arg0: i32) -> (i32, i32) {
    %c0_i32 = arith.constant 0 : i32
    %c0_i32_0 = arith.constant 0 : i32
    %c0_i32_1 = arith.constant 0 : i32
    return %c0_i32, %c0_i32_0 : i32, i32
  }
  func.func @transform_2(%arg0: i32) -> (i32, i32, i32) {
    %c0_i32 = arith.constant 0 : i32
    %c0_i32_0 = arith.constant 0 : i32
    %c0_i32_1 = arith.constant 0 : i32
    return %arg0, %c0_i32, %c0_i32_0 : i32, i32, i32
  }
  func.func @transform_3(%arg0: i32) -> (i32, i32, i32) {
    %c0_i32 = arith.constant 0 : i32
    %c0_i32_0 = arith.constant 0 : i32
    %c0_i32_1 = arith.constant 0 : i32
    return %arg0, %c0_i32, %c0_i32_0 : i32, i32, i32
  }
}

</mosaic_0001>

<bundles_post_ra>
// kernel: tpu_custom_call.1
= control target key start
LH: loop header
LB: loop body
LE: loop exit
PB: predicated region body
PF: predicated region fallthrough
CT: control target
= control target key end

     0   :  { %s570_s0 = inlined_call_operand.vmem [shape: f32[16,8], index: 0, kind: input, shape index: {}]   ;;  %s571_s1 = inlined_call_operand.vmem [shape: f32[128,64], index: 1, kind: input, shape index: {}]   ;;  %s572_s2 = inlined_call_operand.vmem [shape: f32[1,16,128], index: 2, kind: input, shape index: {}]   ;;  %s573_s3 = inlined_call_operand.hbm [shape: f32[1,8,64], index: 3, kind: output, shape index: {}]  }
   0x1   :  { %v17_v0 = vld [vmem:[%s571_s1] sm:$0xff]  ;;  %v18_v1 = vld [vmem:[%s571_s1 + $0x8] sm:$0xff]  ;;  %v19_v2 = vld [vmem:[%s571_s1 + $0x10] sm:$0xff] }
   0x2   :  { %v407_v3 = vpack.c.bf16 %v18_v1, %v17_v0  ;;  %v20_v4 = vld [vmem:[%s571_s1 + $0x18] sm:$0xff]  ;;  %v21_v6 = vld [vmem:[%s571_s1 + $0x20] sm:$0xff]  ;;  %v22_v7 = vld [vmem:[%s571_s1 + $0x28] sm:$0xff] }
   0x3   :  { %v411_v5 = vpack.c.bf16 %v20_v4, %v19_v2  ;;  %v415_v8 = vpack.c.bf16 %v22_v7, %v21_v6  ;;  %v15_v9 = vld [vmem:[%s572_s2] sm:$0xff]  ;;  %v23_v10 = vld [vmem:[%s571_s1 + $0x30] sm:$0xff]  ;;  %v24_v11 = vld [vmem:[%s571_s1 + $0x38] sm:$0xff] }
   0x4   :  { %408 = vmatprep.subr.bf16.mxu0 %v407_v3  ;;  %388 = vmatprep.mubr.f32.mxu0 %v15_v9 }
   0x5   :  { %410 = vmatpush3.bf16.msra.mxu0 %v407_v3 }
   0x6   :  { %412 = vmatprep.subr.bf16.mxu0 %v411_v5 }
   0x7   :  { %8 = vsyncpa [#allocation3], 0  ;;  %v419_v12 = vpack.c.bf16 %v24_v11, %v23_v10  ;;  %v25_v13 = vld [vmem:[%s571_s1 + $0x40] sm:$0xff]  ;;  %v26_v14 = vld [vmem:[%s571_s1 + $0x48] sm:$0xff]  ;;  %vm142_vm0 = vcmask 130048   ;;  %vm304_vm1 = vcmask 523264  }
   0x8   :  { %v423_v15 = vpack.c.bf16 %v26_v14, %v25_v13  ;;  %v27_v16 = vld [vmem:[%s571_s1 + $0x50] sm:$0xff]  ;;  %v28_v17 = vld [vmem:[%s571_s1 + $0x58] sm:$0xff]  ;;  %v29_v19 = vld [vmem:[%s571_s1 + $0x60] sm:$0xff] }
   0x9   :  { %414 = vmatpush3.bf16.msra.mxu0 %v411_v5  ;;  %v427_v18 = vpack.c.bf16 %v28_v17, %v27_v16  ;;  %v30_v20 = vld [vmem:[%s571_s1 + $0x68] sm:$0xff]  ;;  %v31_v22 = vld [vmem:[%s571_s1 + $0x70] sm:$0xff]  ;;  %v32_v23 = vld [vmem:[%s571_s1 + $0x78] sm:$0xff] }
   0xa   :  { %416 = vmatprep.subr.bf16.mxu0 %v415_v8  ;;  %v431_v21 = vpack.c.bf16 %v30_v20, %v29_v19  ;;  %v435_v24 = vpack.c.bf16 %v32_v23, %v31_v22  ;;  %v16_v25 = vld [vmem:[%s572_s2 + $0x8] sm:$0xff]  ;;  %v140_v27 = vld [vmem:[%s570_s0] sm:$0xff] }
   0xb   :  { %v141_v28 = vld [vmem:[%s570_s0 + $0x8] sm:$0xff]  ;;  %s469_s0 = smov [#allocation2]  }
   0xc   :  { %v439_v30 = vpack.c.bf16 %v141_v28, %v140_v27  ;;  %s312_s1 = sshll.u32 %s469_s0, 4  ;;  %s313_s1 = int_to_ptr.vmem [resolvable:$true] %s312_s1 }
   0xd   :  { %418 = vmatpush3.bf16.msra.mxu0 %v415_v8  ;;  %s445_s2 = scalar_lea.vmem %s313_s1, 128  ;;  %p450_p1 = scmp.lt.s32.totalorder %s313_s1, %s313_s1 }
   0xe   :  { %420 = vmatprep.subr.bf16.mxu0 %v419_v12  ;;  %440 = vmatprep.subr.bf16.mxu1 %v439_v30  ;;  %p446_p0 = scmp.ne.s32.totalorder %s313_s1, %s445_s2  ;;  %p451_p2 = scmp.lt.s32.totalorder %s445_s2, %s445_s2 }
   0xf   :  { %442 = vmatpush3.bf16.msra.mxu1 %v439_v30 }
  0x10   :  { %p452_p3 = por %p451_p2, %p450_p1 }
  0x11   :  { %422 = vmatpush3.bf16.msra.mxu0 %v419_v12 }
  0x12   :  { %424 = vmatprep.subr.bf16.mxu0 %v423_v15  ;;  %p453_p4 = pnand %p452_p3, %p446_p0 }
  0x15   :  { %426 = vmatpush3.bf16.msra.mxu0 %v423_v15 }
  0x16   :  { %428 = vmatprep.subr.bf16.mxu0 %v427_v18 }
  0x19   :  { %430 = vmatpush3.bf16.msra.mxu0 %v427_v18 }
  0x1a   :  { %432 = vmatprep.subr.bf16.mxu0 %v431_v21 }
  0x1d   :  { %434 = vmatpush3.bf16.msra.mxu0 %v431_v21 }
  0x1e   :  { %436 = vmatprep.subr.bf16.mxu0 %v435_v24 }
  0x21   :  { %438 = vmatpush3.bf16.msra.mxu0 %v435_v24 }
  0x24   :  { %389 = vmatmul.mubr.f32.vlgmr.msra.gmra.mrb[0].mxu0 %v16_v25 }
  0xf7   :  { %v390_v26 = vpop.f32.mrb[0].mxu0 }
  0xf8   :  { %v99_v29 = vpop.f32.mrb[1].mxu0 }
  0xf9   :  { %108 = vxpose.xlu0.b32.start [1/2] (short) (narrow) %v99_v29, 64 }
  0xfd   :  { %109 = vxpose.xlu0.b32.end [2/2] (short) (narrow) %v390_v26, 64 }
 0x179   :  { %v124_v31 = vpop.trf.xlu0 }
 0x17a   :  { %395 = vmatprep.mubr.msk.f32.mxu1 %vm142_vm0, %v124_v31 }
 0x17d   :  { %v125_v32 = vpop.trf.xlu0 }
 0x17e   :  { %396 = vmatmul.mubr.msk.f32.vlgmr.msra.gmra.mrb[0].mxu1 %vm142_vm0, %v125_v32 }
 0x181   :  { %v126_v33 = vpop.trf.xlu0 }
 0x182   :  { %398 = vmatprep.mubr.msk.f32.mxu1 %vm142_vm0, %v126_v33 }
 0x185   :  { %v127_v34 = vpop.trf.xlu0 }
 0x186   :  { %399 = vmatmul.mubr.msk.f32.gmra.mrb[2].mxu1 %vm142_vm0, %v127_v34 }
 0x189   :  { %v128_v35 = vpop.trf.xlu0 }
 0x18a   :  { %401 = vmatprep.mubr.msk.f32.mxu1 %vm142_vm0, %v128_v35 }
 0x18d   :  { %v129_v36 = vpop.trf.xlu0 }
 0x18e   :  { %402 = vmatmul.mubr.msk.f32.gmra.mrb[4].mxu1 %vm142_vm0, %v129_v36 }
 0x191   :  { %v130_v37 = vpop.trf.xlu0 }
 0x192   :  { %404 = vmatprep.mubr.msk.f32.mxu1 %vm142_vm0, %v130_v37 }
 0x195   :  { %v131_v38 = vpop.trf.xlu0 }
 0x196   :  { %405 = vmatmul.mubr.msk.f32.gmra.mrb[6].mxu1 %vm142_vm0, %v131_v38 }
 0x251   :  { %v397_v39 = vpop.f32.mrb[0].mxu1 }
 0x252   :  { %v233_v40 = vpop.f32.mrb[1].mxu1 }
 0x253   :  { %272 = vxpose.xlu1.b32.start [1/8] (short) (narrow) %v233_v40, 8 }
 0x257   :  { %273 = vxpose.xlu1.b32.cont [2/8] (short) (narrow) %v397_v39, 8 }
 0x259   :  { %v400_v41 = vpop.f32.mrb[2].mxu1 }
 0x25a   :  { %v243_v42 = vpop.f32.mrb[3].mxu1 }
 0x25b   :  { %274 = vxpose.xlu1.b32.cont [3/8] (short) (narrow) %v243_v42, 8 }
 0x25f   :  { %275 = vxpose.xlu1.b32.cont [4/8] (short) (narrow) %v400_v41, 8 }
 0x261   :  { %v403_v43 = vpop.f32.mrb[4].mxu1 }
 0x262   :  { %v253_v44 = vpop.f32.mrb[5].mxu1 }
 0x263   :  { %276 = vxpose.xlu1.b32.cont [5/8] (short) (narrow) %v253_v44, 8 }
 0x267   :  { %277 = vxpose.xlu1.b32.cont [6/8] (short) (narrow) %v403_v43, 8 }
 0x269   :  { %v406_v45 = vpop.f32.mrb[6].mxu1 }
 0x26a   :  { %v263_v46 = vpop.f32.mrb[7].mxu1 }
 0x26b   :  { %278 = vxpose.xlu1.b32.cont [7/8] (short) (narrow) %v263_v46, 8 }
 0x26f   :  { %279 = vxpose.xlu1.b32.end [8/8] (short) (narrow) %v406_v45, 8 }
 0x2d3   :  { %v288_v47 = vpop.trf.xlu1 }
 0x2d4   :  { %305 = vst.msk [vmem:[#allocation2] sm:$0xff] %vm304_vm1, %v288_v47 }
 0x2d5   :  { %456 = shalt.err (!%p453_p4)
}
 0x2d6   :  { %s457_s27 = scalar_lea.hbm %s573_s3, 128 }
 0x2d7   :  { %p458_p5 = scmp.ne.s32.totalorder %s573_s3, %s457_s27  ;;  %p461_p6 = scmp.lt.u32.totalorder %s457_s27, %s573_s3 }
 0x2d9   :  { %p463_p7 = pnand %p461_p6, %p458_p5 }
 0x2db   :  { %466 = shalt.err (!%p463_p7)
}
 0x2dc   :  { %315 = dma.vmem_to_hbm [thread:$0]  %s313_s1, 128, %s573_s3, [#allocation3]  }
 0x2dd   :  { %467 = dma.done.wait [#allocation3], 128  }
 0x2de   :  { %468 = vsyncadd [#allocation3], 4294967168 }
 0x2df   :  { %319 = vsyncpa [#allocation3], 1 }

</bundles_post_ra>
